<compile_context>
chip_gen: v7x
topology: tpu7x:2x2x1
jax: 0.10.0
libtpu: 0.0.40
codegen_flags: <defaults>
</compile_context>

<pallas_src>
import numpy as np
import jax
import jax.numpy as jnp
from jax.experimental import pallas as pl
from jax.experimental.pallas import tpu as pltpu


# ----------------------------- Pallas kernel -------------------------------

def _vmem_spec():
    return pl.BlockSpec(memory_space=pltpu.MemorySpace.VMEM)


def _make_input_block_kernel(n_conv):
    """Build the fused kernel for a fixed (static) number of conv layers."""

    def kernel(*refs):
        scal_ref, prof_ref = refs[0], refs[1]
        conv_refs = [(refs[2 + 2 * i], refs[3 + 2 * i]) for i in range(n_conv)]
        base = 2 + 2 * n_conv
        w1s_ref, w1f_ref, b1_ref, w2_ref, b2_ref, o_ref = refs[base:base + 6]
        pool_refs = refs[base + 6:]                     # VMEM scratch, one per conv layer

        # Hoist all weight loads out of the (unrolled) batch loop.
        scal = scal_ref[...]
        w1s, w1f, b1 = w1s_ref[...], w1f_ref[...], b1_ref[...]
        w2, b2 = w2_ref[...], b2_ref[...]
        conv_w = []
        for wc_ref, bc_ref in conv_refs:
            taps = [wc_ref[k] for k in range(wc_ref.shape[0])]   # each (Cin, Cout)
            conv_w.append((taps, bc_ref[...]))

        B = prof_ref.shape[0]
        for b in range(B):                              # tiny static batch: fully unrolled
            h = prof_ref[b]                             # (L, Cin) channel-last profile
            for li, (taps, bc) in enumerate(conv_w):
                K = len(taps)
                L = h.shape[0]
                Lout = L - K + 1
                # Conv1d as a sum of K tap matmuls (im2col via in-VMEM static slices).
                y = jnp.dot(h[0:Lout, :], taps[0], preferred_element_type=jnp.float32)
                for k in range(1, K):
                    y = y + jnp.dot(h[k:k + Lout, :], taps[k],
                                    preferred_element_type=jnp.float32)
                y = jnp.maximum(y + bc, 0.0)            # bias + ReLU
                # MaxPool1d(kernel=2, stride=2): elementwise max of adjacent rows.
                Lp = Lout // 2
                pr = pool_refs[li]
                for p in range(Lp):
                    pr[p:p + 1, :] = jnp.maximum(y[2 * p:2 * p + 1, :],
                                                 y[2 * p + 1:2 * p + 2, :])
                h = pr[...]                             # (Lp, Cout)
                # TODO(synk): nn.Dropout2d is identity at inference; training-mode
                # stochastic channel dropout is not implemented here.

            # Linear(feat -> H) + ReLU: the torch flatten/concat is folded into a
            # split matmul (scalars part + per-position conv-feature parts; w1f rows
            # were permuted to (position, channel) order in prepare_params).
            zb = jnp.dot(scal[b:b + 1, :], w1s, preferred_element_type=jnp.float32) + b1
            Cf = h.shape[1]
            for l in range(h.shape[0]):
                zb = zb + jnp.dot(h[l:l + 1, :], w1f[l * Cf:(l + 1) * Cf, :],
                                  preferred_element_type=jnp.float32)
            zb = jnp.maximum(zb, 0.0)
            # Linear(H -> H) + ReLU
            ob = jnp.dot(zb, w2, preferred_element_type=jnp.float32) + b2
            o_ref[b:b + 1, :] = jnp.maximum(ob, 0.0)

    return kernel


# ------------------------------ JAX glue ------------------------------------

def prepare_params(params, cfg):
    """One-time re-layout of weights into kernel-ready form (hoisted off the fwd path)."""
    n_s = cfg["n_scalars"]
    conv = []
    for w_eff, bias in params["conv"]:
        Cout, Cin, K = w_eff.shape
        conv.append((jnp.transpose(w_eff, (2, 1, 0)),   # (K, Cin, Cout)
                     bias.reshape(1, Cout)))
    C_last = params["conv"][-1][0].shape[0]
    w1 = params["w1"]
    feat, H = w1.shape
    conv_feat = feat - n_s
    Lp_last = conv_feat // C_last
    # torch flattens (B, C, L) channel-major; the kernel produces (position, channel)
    # order, so permute the conv-feature rows of w1 accordingly.
    w1f = (w1[n_s:, :].reshape(C_last, Lp_last, H)
           .transpose(1, 0, 2).reshape(conv_feat, H))
    return dict(conv=tuple(conv), w1s=w1[:n_s, :], w1f=w1f,
                b1=params["b1"].reshape(1, H),
                w2=params["w2"], b2=params["b2"].reshape(1, H))


def input_block_forward(x, prepped, cfg):
    B = x.shape[0]
    n_s, n_p, psize = cfg["n_scalars"], cfg["n_profiles"], cfg["profile_size"]
    scal = x[:, :n_s]
    prof = jnp.transpose(x[:, n_s:].reshape(B, n_p, psize), (0, 2, 1))  # (B, L, C)

    conv = prepped["conv"]
    H = prepped["w2"].shape[1]
    conv_args = [a for wb in conv for a in wb]

    # Per-conv-layer pooled-activation scratch (few hundred bytes each).
    scratch = []
    L = psize
    for wc, _ in conv:
        K, _, Cout = wc.shape
        Lp = (L - K + 1) // 2
        scratch.append(pltpu.VMEM((Lp, Cout), jnp.float32))
        L = Lp

    n_in = 2 + len(conv_args) + 5
    return pl.pallas_call(
        _make_input_block_kernel(len(conv)),
        out_shape=jax.ShapeDtypeStruct((B, H), jnp.float32),
        in_specs=[_vmem_spec()] * n_in,
        out_specs=_vmem_spec(),
        scratch_shapes=scratch,
    )(scal, prof, *conv_args,
      prepped["w1s"], prepped["w1f"], prepped["b1"], prepped["w2"], prepped["b2"])


# --------------------------- numpy reference ---------------------------------

def reference_forward(x, params, cfg):
    x = np.asarray(x, np.float32)
    n_s, n_p, psize = cfg["n_scalars"], cfg["n_profiles"], cfg["profile_size"]
    B = x.shape[0]
    xs = x[:, :n_s]
    h = x[:, n_s:].reshape(B, n_p, psize)
    for (w_eff, bias) in params["conv"]:
        w = np.asarray(w_eff, np.float32)
        b = np.asarray(bias, np.float32)
        Cout, Cin, K = w.shape
        Lin = h.shape[2]
        Lout = Lin - K + 1
        y = np.zeros((B, Cout, Lout), np.float32)
        for k in range(K):
            y += np.einsum("oc,bcl->bol", w[:, :, k], h[:, :, k:k + Lout])
        y = np.maximum(y + b[None, :, None], 0.0)
        Lp = Lout // 2
        h = y[:, :, :2 * Lp].reshape(B, Cout, Lp, 2).max(axis=-1)
    flat = h.reshape(B, -1)
    full = np.concatenate([xs, flat], axis=1)
    h1 = np.maximum(full @ np.asarray(params["w1"]) + np.asarray(params["b1"]), 0.0)
    return np.maximum(h1 @ np.asarray(params["w2"]) + np.asarray(params["b2"]), 0.0)


# ------------------------------- main ----------------------------------------

if __name__ == "__main__":
    cfg = dict(n_scalars=4, n_profiles=2, profile_size=16,
               layer_sizes=[4, 8], kernel_size=3, linear_size=32)
    B = 2

    key = jax.random.PRNGKey(0)
    keys = jax.random.split(key, 12)

    x = jax.random.normal(
        keys[0], (B, cfg["n_scalars"] + cfg["n_profiles"] * cfg["profile_size"]),
        jnp.float32)

    # conv layers: weight_norm(Conv1d) -> effective weight g * v / ||v|| (norm over all dims but 0)
    conv_params = []
    in_ch = cfg["n_profiles"]
    ki = 1
    for out_ch in cfg["layer_sizes"]:
        v = 0.4 * jax.random.normal(keys[ki], (out_ch, in_ch, cfg["kernel_size"]), jnp.float32)
        g = 1.0 + 0.1 * jax.random.normal(keys[ki + 1], (out_ch,), jnp.float32)
        bias = 0.1 * jax.random.normal(keys[ki + 2], (out_ch,), jnp.float32)
        ki += 3
        norm = jnp.sqrt(jnp.sum(v * v, axis=(1, 2), keepdims=True))
        w_eff = g[:, None, None] * v / norm
        conv_params.append((w_eff, bias))
        in_ch = out_ch

    # conv feature size (matches calculate_conv_output_size chain)
    L = cfg["profile_size"]
    for _ in cfg["layer_sizes"]:
        L = L - cfg["kernel_size"] + 1      # conv, pad=0, dil=1, stride=1
        L = L // 2                          # maxpool k=2, stride=2
    conv_out = L * cfg["layer_sizes"][-1]
    feat = cfg["n_scalars"] + conv_out
    H = cfg["linear_size"]

    w1 = jax.random.normal(keys[ki], (feat, H), jnp.float32) / np.sqrt(feat)
    b1 = 0.1 * jax.random.normal(keys[ki + 1], (1, H), jnp.float32)
    w2 = jax.random.normal(keys[ki + 2], (H, H), jnp.float32) / np.sqrt(H)
    b2 = 0.1 * jax.random.normal(keys[ki + 3], (1, H), jnp.float32)

    params = dict(conv=conv_params, w1=w1, b1=b1, w2=w2, b2=b2)

    prepped = prepare_params(params, cfg)                 # one-time weight re-layout
    fwd = jax.jit(lambda xx, pp: input_block_forward(xx, pp, cfg))

    out = jax.block_until_ready(fwd(x, prepped))
    assert out.shape == (B, H), out.shape

    ref = reference_forward(np.asarray(x), params, cfg)
    np.testing.assert_allclose(np.asarray(out), ref, rtol=2e-2, atol=2e-2)
    print("KERNEL_OK")
</pallas_src>

<mosaic_0001>
module attributes {stable_mosaic.version = 11 : i64} {
  func.func @kernel(%arg0: memref<2x4xf32, #tpu.memory_space<vmem>>, %arg1: memref<2x16x2xf32, #tpu.memory_space<vmem>>, %arg2: memref<3x2x4xf32, #tpu.memory_space<vmem>>, %arg3: memref<1x4xf32, #tpu.memory_space<vmem>>, %arg4: memref<3x4x8xf32, #tpu.memory_space<vmem>>, %arg5: memref<1x8xf32, #tpu.memory_space<vmem>>, %arg6: memref<4x32xf32, #tpu.memory_space<vmem>>, %arg7: memref<16x32xf32, #tpu.memory_space<vmem>>, %arg8: memref<1x32xf32, #tpu.memory_space<vmem>>, %arg9: memref<32x32xf32, #tpu.memory_space<vmem>>, %arg10: memref<1x32xf32, #tpu.memory_space<vmem>>, %arg11: memref<2x32xf32, #tpu.memory_space<vmem>>, %arg12: memref<7x4xf32, #tpu.memory_space<vmem>>, %arg13: memref<2x8xf32, #tpu.memory_space<vmem>>) attributes {dimension_semantics = [], scalar_prefetch = 0 : i64, scratch_operands = 2 : i64, tpu.core_type = #tpu.core_type<tc>} {
    %c0 = arith.constant 0 : index
    %c0_0 = arith.constant 0 : index
    %0 = vector.load %arg0[%c0, %c0_0] : memref<2x4xf32, #tpu.memory_space<vmem>>, vector<2x4xf32>
    %c0_1 = arith.constant 0 : index
    %c0_2 = arith.constant 0 : index
    %1 = vector.load %arg6[%c0_1, %c0_2] : memref<4x32xf32, #tpu.memory_space<vmem>>, vector<4x32xf32>
    %c0_3 = arith.constant 0 : index
    %c0_4 = arith.constant 0 : index
    %2 = vector.load %arg7[%c0_3, %c0_4] : memref<16x32xf32, #tpu.memory_space<vmem>>, vector<16x32xf32>
    %c0_5 = arith.constant 0 : index
    %c0_6 = arith.constant 0 : index
    %3 = vector.load %arg8[%c0_5, %c0_6] : memref<1x32xf32, #tpu.memory_space<vmem>>, vector<1x32xf32>
    %c0_7 = arith.constant 0 : index
    %c0_8 = arith.constant 0 : index
    %4 = vector.load %arg9[%c0_7, %c0_8] : memref<32x32xf32, #tpu.memory_space<vmem>>, vector<32x32xf32>
    %c0_9 = arith.constant 0 : index
    %c0_10 = arith.constant 0 : index
    %5 = vector.load %arg10[%c0_9, %c0_10] : memref<1x32xf32, #tpu.memory_space<vmem>>, vector<1x32xf32>
    %c0_11 = arith.constant 0 : index
    %c0_12 = arith.constant 0 : index
    %c0_13 = arith.constant 0 : index
    %6 = vector.load %arg2[%c0_11, %c0_12, %c0_13] : memref<3x2x4xf32, #tpu.memory_space<vmem>>, vector<1x2x4xf32>
    %7 = vector.shape_cast %6 : vector<1x2x4xf32> to vector<2x4xf32>
    %c1 = arith.constant 1 : index
    %c0_14 = arith.constant 0 : index
    %c0_15 = arith.constant 0 : index
    %8 = vector.load %arg2[%c1, %c0_14, %c0_15] : memref<3x2x4xf32, #tpu.memory_space<vmem>>, vector<1x2x4xf32>
    %9 = vector.shape_cast %8 : vector<1x2x4xf32> to vector<2x4xf32>
    %c2 = arith.constant 2 : index
    %c0_16 = arith.constant 0 : index
    %c0_17 = arith.constant 0 : index
    %10 = vector.load %arg2[%c2, %c0_16, %c0_17] : memref<3x2x4xf32, #tpu.memory_space<vmem>>, vector<1x2x4xf32>
    %11 = vector.shape_cast %10 : vector<1x2x4xf32> to vector<2x4xf32>
    %c0_18 = arith.constant 0 : index
    %c0_19 = arith.constant 0 : index
    %12 = vector.load %arg3[%c0_18, %c0_19] : memref<1x4xf32, #tpu.memory_space<vmem>>, vector<1x4xf32>
    %c0_20 = arith.constant 0 : index
    %c0_21 = arith.constant 0 : index
    %c0_22 = arith.constant 0 : index
    %13 = vector.load %arg4[%c0_20, %c0_21, %c0_22] : memref<3x4x8xf32, #tpu.memory_space<vmem>>, vector<1x4x8xf32>
    %14 = vector.shape_cast %13 : vector<1x4x8xf32> to vector<4x8xf32>
    %c1_23 = arith.constant 1 : index
    %c0_24 = arith.constant 0 : index
    %c0_25 = arith.constant 0 : index
    %15 = vector.load %arg4[%c1_23, %c0_24, %c0_25] : memref<3x4x8xf32, #tpu.memory_space<vmem>>, vector<1x4x8xf32>
    %16 = vector.shape_cast %15 : vector<1x4x8xf32> to vector<4x8xf32>
    %c2_26 = arith.constant 2 : index
    %c0_27 = arith.constant 0 : index
    %c0_28 = arith.constant 0 : index
    %17 = vector.load %arg4[%c2_26, %c0_27, %c0_28] : memref<3x4x8xf32, #tpu.memory_space<vmem>>, vector<1x4x8xf32>
    %18 = vector.shape_cast %17 : vector<1x4x8xf32> to vector<4x8xf32>
    %c0_29 = arith.constant 0 : index
    %c0_30 = arith.constant 0 : index
    %19 = vector.load %arg5[%c0_29, %c0_30] : memref<1x8xf32, #tpu.memory_space<vmem>>, vector<1x8xf32>
    %c0_31 = arith.constant 0 : index
    %c0_32 = arith.constant 0 : index
    %c0_33 = arith.constant 0 : index
    %20 = vector.load %arg1[%c0_31, %c0_32, %c0_33] : memref<2x16x2xf32, #tpu.memory_space<vmem>>, vector<1x16x2xf32>
    %21 = vector.shape_cast %20 : vector<1x16x2xf32> to vector<16x2xf32>
    %22 = vector.extract_strided_slice %21 {offsets = [0, 0], sizes = [14, 2], strides = [1, 1]} : vector<16x2xf32> to vector<14x2xf32>
    %cst = arith.constant dense<0.000000e+00> : vector<14x4xf32>
    %23 = tpu.matmul %22, %7, %cst {dimension_numbers = #tpu.dot_dimension_numbers<[1], [0], [0], [1], [0, 0, 1, 1], [], []>} : vector<14x2xf32>, vector<2x4xf32>, vector<14x4xf32> -> vector<14x4xf32>
    %24 = vector.extract_strided_slice %21 {offsets = [1, 0], sizes = [14, 2], strides = [1, 1]} : vector<16x2xf32> to vector<14x2xf32>
    %cst_34 = arith.constant dense<0.000000e+00> : vector<14x4xf32>
    %25 = tpu.matmul %24, %9, %cst_34 {dimension_numbers = #tpu.dot_dimension_numbers<[1], [0], [0], [1], [0, 0, 1, 1], [], []>} : vector<14x2xf32>, vector<2x4xf32>, vector<14x4xf32> -> vector<14x4xf32>
    %26 = arith.addf %23, %25 : vector<14x4xf32>
    %27 = vector.extract_strided_slice %21 {offsets = [2, 0], sizes = [14, 2], strides = [1, 1]} : vector<16x2xf32> to vector<14x2xf32>
    %cst_35 = arith.constant dense<0.000000e+00> : vector<14x4xf32>
    %28 = tpu.matmul %27, %11, %cst_35 {dimension_numbers = #tpu.dot_dimension_numbers<[1], [0], [0], [1], [0, 0, 1, 1], [], []>} : vector<14x2xf32>, vector<2x4xf32>, vector<14x4xf32> -> vector<14x4xf32>
    %29 = arith.addf %26, %28 : vector<14x4xf32>
    %30 = vector.broadcast %12 : vector<1x4xf32> to vector<14x4xf32>
    %31 = arith.addf %29, %30 : vector<14x4xf32>
    %cst_36 = arith.constant 0.000000e+00 : f32
    %32 = vector.broadcast %cst_36 : f32 to vector<14x4xf32>
    %33 = arith.maximumf %31, %32 : vector<14x4xf32>
    %34 = vector.extract_strided_slice %33 {offsets = [0, 0], sizes = [1, 4], strides = [1, 1]} : vector<14x4xf32> to vector<1x4xf32>
    %35 = vector.extract_strided_slice %33 {offsets = [1, 0], sizes = [1, 4], strides = [1, 1]} : vector<14x4xf32> to vector<1x4xf32>
    %36 = arith.maximumf %34, %35 : vector<1x4xf32>
    %c0_37 = arith.constant 0 : index
    %c0_38 = arith.constant 0 : index
    %37 = vector.load %arg12[%c0_37, %c0_38] : memref<7x4xf32, #tpu.memory_space<vmem>>, vector<1x4xf32>
    tpu.vector_store %arg12[%c0_37, %c0_38], %36 {strides = array<i32>} : memref<7x4xf32, #tpu.memory_space<vmem>>, vector<1x4xf32>,
    %38 = vector.extract_strided_slice %33 {offsets = [2, 0], sizes = [1, 4], strides = [1, 1]} : vector<14x4xf32> to vector<1x4xf32>
    %39 = vector.extract_strided_slice %33 {offsets = [3, 0], sizes = [1, 4], strides = [1, 1]} : vector<14x4xf32> to vector<1x4xf32>
    %40 = arith.maximumf %38, %39 : vector<1x4xf32>
    %c1_39 = arith.constant 1 : index
    %c0_40 = arith.constant 0 : index
    %41 = vector.load %arg12[%c1_39, %c0_40] : memref<7x4xf32, #tpu.memory_space<vmem>>, vector<1x4xf32>
    tpu.vector_store %arg12[%c1_39, %c0_40], %40 {strides = array<i32>} : memref<7x4xf32, #tpu.memory_space<vmem>>, vector<1x4xf32>,
    %42 = vector.extract_strided_slice %33 {offsets = [4, 0], sizes = [1, 4], strides = [1, 1]} : vector<14x4xf32> to vector<1x4xf32>
    %43 = vector.extract_strided_slice %33 {offsets = [5, 0], sizes = [1, 4], strides = [1, 1]} : vector<14x4xf32> to vector<1x4xf32>
    %44 = arith.maximumf %42, %43 : vector<1x4xf32>
    %c2_41 = arith.constant 2 : index
    %c0_42 = arith.constant 0 : index
    %45 = vector.load %arg12[%c2_41, %c0_42] : memref<7x4xf32, #tpu.memory_space<vmem>>, vector<1x4xf32>
    tpu.vector_store %arg12[%c2_41, %c0_42], %44 {strides = array<i32>} : memref<7x4xf32, #tpu.memory_space<vmem>>, vector<1x4xf32>,
    %46 = vector.extract_strided_slice %33 {offsets = [6, 0], sizes = [1, 4], strides = [1, 1]} : vector<14x4xf32> to vector<1x4xf32>
    %47 = vector.extract_strided_slice %33 {offsets = [7, 0], sizes = [1, 4], strides = [1, 1]} : vector<14x4xf32> to vector<1x4xf32>
    %48 = arith.maximumf %46, %47 : vector<1x4xf32>
    %c3 = arith.constant 3 : index
    %c0_43 = arith.constant 0 : index
    %49 = vector.load %arg12[%c3, %c0_43] : memref<7x4xf32, #tpu.memory_space<vmem>>, vector<1x4xf32>
    tpu.vector_store %arg12[%c3, %c0_43], %48 {strides = array<i32>} : memref<7x4xf32, #tpu.memory_space<vmem>>, vector<1x4xf32>,
    %50 = vector.extract_strided_slice %33 {offsets = [8, 0], sizes = [1, 4], strides = [1, 1]} : vector<14x4xf32> to vector<1x4xf32>
    %51 = vector.extract_strided_slice %33 {offsets = [9, 0], sizes = [1, 4], strides = [1, 1]} : vector<14x4xf32> to vector<1x4xf32>
    %52 = arith.maximumf %50, %51 : vector<1x4xf32>
    %c4 = arith.constant 4 : index
    %c0_44 = arith.constant 0 : index
    %53 = vector.load %arg12[%c4, %c0_44] : memref<7x4xf32, #tpu.memory_space<vmem>>, vector<1x4xf32>
    tpu.vector_store %arg12[%c4, %c0_44], %52 {strides = array<i32>} : memref<7x4xf32, #tpu.memory_space<vmem>>, vector<1x4xf32>,
    %54 = vector.extract_strided_slice %33 {offsets = [10, 0], sizes = [1, 4], strides = [1, 1]} : vector<14x4xf32> to vector<1x4xf32>
    %55 = vector.extract_strided_slice %33 {offsets = [11, 0], sizes = [1, 4], strides = [1, 1]} : vector<14x4xf32> to vector<1x4xf32>
    %56 = arith.maximumf %54, %55 : vector<1x4xf32>
    %c5 = arith.constant 5 : index
    %c0_45 = arith.constant 0 : index
    %57 = vector.load %arg12[%c5, %c0_45] : memref<7x4xf32, #tpu.memory_space<vmem>>, vector<1x4xf32>
    tpu.vector_store %arg12[%c5, %c0_45], %56 {strides = array<i32>} : memref<7x4xf32, #tpu.memory_space<vmem>>, vector<1x4xf32>,
    %58 = vector.extract_strided_slice %33 {offsets = [12, 0], sizes = [1, 4], strides = [1, 1]} : vector<14x4xf32> to vector<1x4xf32>
    %59 = vector.extract_strided_slice %33 {offsets = [13, 0], sizes = [1, 4], strides = [1, 1]} : vector<14x4xf32> to vector<1x4xf32>
    %60 = arith.maximumf %58, %59 : vector<1x4xf32>
    %c6 = arith.constant 6 : index
    %c0_46 = arith.constant 0 : index
    %61 = vector.load %arg12[%c6, %c0_46] : memref<7x4xf32, #tpu.memory_space<vmem>>, vector<1x4xf32>
    tpu.vector_store %arg12[%c6, %c0_46], %60 {strides = array<i32>} : memref<7x4xf32, #tpu.memory_space<vmem>>, vector<1x4xf32>,
    %c0_47 = arith.constant 0 : index
    %c0_48 = arith.constant 0 : index
    %62 = vector.load %arg12[%c0_47, %c0_48] : memref<7x4xf32, #tpu.memory_space<vmem>>, vector<7x4xf32>
    %63 = vector.extract_strided_slice %62 {offsets = [0, 0], sizes = [5, 4], strides = [1, 1]} : vector<7x4xf32> to vector<5x4xf32>
    %cst_49 = arith.constant dense<0.000000e+00> : vector<5x8xf32>
    %64 = tpu.matmul %63, %14, %cst_49 {dimension_numbers = #tpu.dot_dimension_numbers<[1], [0], [0], [1], [0, 0, 1, 1], [], []>} : vector<5x4xf32>, vector<4x8xf32>, vector<5x8xf32> -> vector<5x8xf32>
    %65 = vector.extract_strided_slice %62 {offsets = [1, 0], sizes = [5, 4], strides = [1, 1]} : vector<7x4xf32> to vector<5x4xf32>
    %cst_50 = arith.constant dense<0.000000e+00> : vector<5x8xf32>
    %66 = tpu.matmul %65, %16, %cst_50 {dimension_numbers = #tpu.dot_dimension_numbers<[1], [0], [0], [1], [0, 0, 1, 1], [], []>} : vector<5x4xf32>, vector<4x8xf32>, vector<5x8xf32> -> vector<5x8xf32>
    %67 = arith.addf %64, %66 : vector<5x8xf32>
    %68 = vector.extract_strided_slice %62 {offsets = [2, 0], sizes = [5, 4], strides = [1, 1]} : vector<7x4xf32> to vector<5x4xf32>
    %cst_51 = arith.constant dense<0.000000e+00> : vector<5x8xf32>
    %69 = tpu.matmul %68, %18, %cst_51 {dimension_numbers = #tpu.dot_dimension_numbers<[1], [0], [0], [1], [0, 0, 1, 1], [], []>} : vector<5x4xf32>, vector<4x8xf32>, vector<5x8xf32> -> vector<5x8xf32>
    %70 = arith.addf %67, %69 : vector<5x8xf32>
    %71 = vector.broadcast %19 : vector<1x8xf32> to vector<5x8xf32>
    %72 = arith.addf %70, %71 : vector<5x8xf32>
    %cst_52 = arith.constant 0.000000e+00 : f32
    %73 = vector.broadcast %cst_52 : f32 to vector<5x8xf32>
    %74 = arith.maximumf %72, %73 : vector<5x8xf32>
    %75 = vector.extract_strided_slice %74 {offsets = [0, 0], sizes = [1, 8], strides = [1, 1]} : vector<5x8xf32> to vector<1x8xf32>
    %76 = vector.extract_strided_slice %74 {offsets = [1, 0], sizes = [1, 8], strides = [1, 1]} : vector<5x8xf32> to vector<1x8xf32>
    %77 = arith.maximumf %75, %76 : vector<1x8xf32>
    %c0_53 = arith.constant 0 : index
    %c0_54 = arith.constant 0 : index
    %78 = vector.load %arg13[%c0_53, %c0_54] : memref<2x8xf32, #tpu.memory_space<vmem>>, vector<1x8xf32>
    tpu.vector_store %arg13[%c0_53, %c0_54], %77 {strides = array<i32>} : memref<2x8xf32, #tpu.memory_space<vmem>>, vector<1x8xf32>,
    %79 = vector.extract_strided_slice %74 {offsets = [2, 0], sizes = [1, 8], strides = [1, 1]} : vector<5x8xf32> to vector<1x8xf32>
    %80 = vector.extract_strided_slice %74 {offsets = [3, 0], sizes = [1, 8], strides = [1, 1]} : vector<5x8xf32> to vector<1x8xf32>
    %81 = arith.maximumf %79, %80 : vector<1x8xf32>
    %c1_55 = arith.constant 1 : index
    %c0_56 = arith.constant 0 : index
    %82 = vector.load %arg13[%c1_55, %c0_56] : memref<2x8xf32, #tpu.memory_space<vmem>>, vector<1x8xf32>
    tpu.vector_store %arg13[%c1_55, %c0_56], %81 {strides = array<i32>} : memref<2x8xf32, #tpu.memory_space<vmem>>, vector<1x8xf32>,
    %c0_57 = arith.constant 0 : index
    %c0_58 = arith.constant 0 : index
    %83 = vector.load %arg13[%c0_57, %c0_58] : memref<2x8xf32, #tpu.memory_space<vmem>>, vector<2x8xf32>
    %84 = vector.extract_strided_slice %0 {offsets = [0, 0], sizes = [1, 4], strides = [1, 1]} : vector<2x4xf32> to vector<1x4xf32>
    %cst_59 = arith.constant dense<0.000000e+00> : vector<1x32xf32>
    %85 = tpu.matmul %84, %1, %cst_59 {dimension_numbers = #tpu.dot_dimension_numbers<[1], [0], [0], [1], [0, 0, 1, 1], [], []>} : vector<1x4xf32>, vector<4x32xf32>, vector<1x32xf32> -> vector<1x32xf32>
    %86 = arith.addf %85, %3 : vector<1x32xf32>
    %87 = vector.extract_strided_slice %83 {offsets = [0, 0], sizes = [1, 8], strides = [1, 1]} : vector<2x8xf32> to vector<1x8xf32>
    %88 = vector.extract_strided_slice %2 {offsets = [0, 0], sizes = [8, 32], strides = [1, 1]} : vector<16x32xf32> to vector<8x32xf32>
    %cst_60 = arith.constant dense<0.000000e+00> : vector<1x32xf32>
    %89 = tpu.matmul %87, %88, %cst_60 {dimension_numbers = #tpu.dot_dimension_numbers<[1], [0], [0], [1], [0, 0, 1, 1], [], []>} : vector<1x8xf32>, vector<8x32xf32>, vector<1x32xf32> -> vector<1x32xf32>
    %90 = arith.addf %86, %89 : vector<1x32xf32>
    %91 = vector.extract_strided_slice %83 {offsets = [1, 0], sizes = [1, 8], strides = [1, 1]} : vector<2x8xf32> to vector<1x8xf32>
    %92 = vector.extract_strided_slice %2 {offsets = [8, 0], sizes = [8, 32], strides = [1, 1]} : vector<16x32xf32> to vector<8x32xf32>
    %cst_61 = arith.constant dense<0.000000e+00> : vector<1x32xf32>
    %93 = tpu.matmul %91, %92, %cst_61 {dimension_numbers = #tpu.dot_dimension_numbers<[1], [0], [0], [1], [0, 0, 1, 1], [], []>} : vector<1x8xf32>, vector<8x32xf32>, vector<1x32xf32> -> vector<1x32xf32>
    %94 = arith.addf %90, %93 : vector<1x32xf32>
    %cst_62 = arith.constant 0.000000e+00 : f32
    %95 = vector.broadcast %cst_62 : f32 to vector<1x32xf32>
    %96 = arith.maximumf %94, %95 : vector<1x32xf32>
    %cst_63 = arith.constant dense<0.000000e+00> : vector<1x32xf32>
    %97 = tpu.matmul %96, %4, %cst_63 {dimension_numbers = #tpu.dot_dimension_numbers<[1], [0], [0], [1], [0, 0, 1, 1], [], []>} : vector<1x32xf32>, vector<32x32xf32>, vector<1x32xf32> -> vector<1x32xf32>
    %98 = arith.addf %97, %5 : vector<1x32xf32>
    %cst_64 = arith.constant 0.000000e+00 : f32
    %99 = vector.broadcast %cst_64 : f32 to vector<1x32xf32>
    %100 = arith.maximumf %98, %99 : vector<1x32xf32>
    %c0_65 = arith.constant 0 : index
    %c0_66 = arith.constant 0 : index
    %101 = vector.load %arg11[%c0_65, %c0_66] : memref<2x32xf32, #tpu.memory_space<vmem>>, vector<1x32xf32>
    tpu.vector_store %arg11[%c0_65, %c0_66], %100 {strides = array<i32>} : memref<2x32xf32, #tpu.memory_space<vmem>>, vector<1x32xf32>,
    %c1_67 = arith.constant 1 : index
    %c0_68 = arith.constant 0 : index
    %c0_69 = arith.constant 0 : index
    %102 = vector.load %arg1[%c1_67, %c0_68, %c0_69] : memref<2x16x2xf32, #tpu.memory_space<vmem>>, vector<1x16x2xf32>
    %103 = vector.shape_cast %102 : vector<1x16x2xf32> to vector<16x2xf32>
    %104 = vector.extract_strided_slice %103 {offsets = [0, 0], sizes = [14, 2], strides = [1, 1]} : vector<16x2xf32> to vector<14x2xf32>
    %cst_70 = arith.constant dense<0.000000e+00> : vector<14x4xf32>
    %105 = tpu.matmul %104, %7, %cst_70 {dimension_numbers = #tpu.dot_dimension_numbers<[1], [0], [0], [1], [0, 0, 1, 1], [], []>} : vector<14x2xf32>, vector<2x4xf32>, vector<14x4xf32> -> vector<14x4xf32>
    %106 = vector.extract_strided_slice %103 {offsets = [1, 0], sizes = [14, 2], strides = [1, 1]} : vector<16x2xf32> to vector<14x2xf32>
    %cst_71 = arith.constant dense<0.000000e+00> : vector<14x4xf32>
    %107 = tpu.matmul %106, %9, %cst_71 {dimension_numbers = #tpu.dot_dimension_numbers<[1], [0], [0], [1], [0, 0, 1, 1], [], []>} : vector<14x2xf32>, vector<2x4xf32>, vector<14x4xf32> -> vector<14x4xf32>
    %108 = arith.addf %105, %107 : vector<14x4xf32>
    %109 = vector.extract_strided_slice %103 {offsets = [2, 0], sizes = [14, 2], strides = [1, 1]} : vector<16x2xf32> to vector<14x2xf32>
    %cst_72 = arith.constant dense<0.000000e+00> : vector<14x4xf32>
    %110 = tpu.matmul %109, %11, %cst_72 {dimension_numbers = #tpu.dot_dimension_numbers<[1], [0], [0], [1], [0, 0, 1, 1], [], []>} : vector<14x2xf32>, vector<2x4xf32>, vector<14x4xf32> -> vector<14x4xf32>
    %111 = arith.addf %108, %110 : vector<14x4xf32>
    %112 = vector.broadcast %12 : vector<1x4xf32> to vector<14x4xf32>
    %113 = arith.addf %111, %112 : vector<14x4xf32>
    %cst_73 = arith.constant 0.000000e+00 : f32
    %114 = vector.broadcast %cst_73 : f32 to vector<14x4xf32>
    %115 = arith.maximumf %113, %114 : vector<14x4xf32>
    %116 = vector.extract_strided_slice %115 {offsets = [0, 0], sizes = [1, 4], strides = [1, 1]} : vector<14x4xf32> to vector<1x4xf32>
    %117 = vector.extract_strided_slice %115 {offsets = [1, 0], sizes = [1, 4], strides = [1, 1]} : vector<14x4xf32> to vector<1x4xf32>
    %118 = arith.maximumf %116, %117 : vector<1x4xf32>
    %c0_74 = arith.constant 0 : index
    %c0_75 = arith.constant 0 : index
    %119 = vector.load %arg12[%c0_74, %c0_75] : memref<7x4xf32, #tpu.memory_space<vmem>>, vector<1x4xf32>
    tpu.vector_store %arg12[%c0_74, %c0_75], %118 {strides = array<i32>} : memref<7x4xf32, #tpu.memory_space<vmem>>, vector<1x4xf32>,
    %120 = vector.extract_strided_slice %115 {offsets = [2, 0], sizes = [1, 4], strides = [1, 1]} : vector<14x4xf32> to vector<1x4xf32>
    %121 = vector.extract_strided_slice %115 {offsets = [3, 0], sizes = [1, 4], strides = [1, 1]} : vector<14x4xf32> to vector<1x4xf32>
    %122 = arith.maximumf %120, %121 : vector<1x4xf32>
    %c1_76 = arith.constant 1 : index
    %c0_77 = arith.constant 0 : index
    %123 = vector.load %arg12[%c1_76, %c0_77] : memref<7x4xf32, #tpu.memory_space<vmem>>, vector<1x4xf32>
    tpu.vector_store %arg12[%c1_76, %c0_77], %122 {strides = array<i32>} : memref<7x4xf32, #tpu.memory_space<vmem>>, vector<1x4xf32>,
    %124 = vector.extract_strided_slice %115 {offsets = [4, 0], sizes = [1, 4], strides = [1, 1]} : vector<14x4xf32> to vector<1x4xf32>
    %125 = vector.extract_strided_slice %115 {offsets = [5, 0], sizes = [1, 4], strides = [1, 1]} : vector<14x4xf32> to vector<1x4xf32>
    %126 = arith.maximumf %124, %125 : vector<1x4xf32>
    %c2_78 = arith.constant 2 : index
    %c0_79 = arith.constant 0 : index
    %127 = vector.load %arg12[%c2_78, %c0_79] : memref<7x4xf32, #tpu.memory_space<vmem>>, vector<1x4xf32>
    tpu.vector_store %arg12[%c2_78, %c0_79], %126 {strides = array<i32>} : memref<7x4xf32, #tpu.memory_space<vmem>>, vector<1x4xf32>,
    %128 = vector.extract_strided_slice %115 {offsets = [6, 0], sizes = [1, 4], strides = [1, 1]} : vector<14x4xf32> to vector<1x4xf32>
    %129 = vector.extract_strided_slice %115 {offsets = [7, 0], sizes = [1, 4], strides = [1, 1]} : vector<14x4xf32> to vector<1x4xf32>
    %130 = arith.maximumf %128, %129 : vector<1x4xf32>
    %c3_80 = arith.constant 3 : index
    %c0_81 = arith.constant 0 : index
    %131 = vector.load %arg12[%c3_80, %c0_81] : memref<7x4xf32, #tpu.memory_space<vmem>>, vector<1x4xf32>
    tpu.vector_store %arg12[%c3_80, %c0_81], %130 {strides = array<i32>} : memref<7x4xf32, #tpu.memory_space<vmem>>, vector<1x4xf32>,
    %132 = vector.extract_strided_slice %115 {offsets = [8, 0], sizes = [1, 4], strides = [1, 1]} : vector<14x4xf32> to vector<1x4xf32>
    %133 = vector.extract_strided_slice %115 {offsets = [9, 0], sizes = [1, 4], strides = [1, 1]} : vector<14x4xf32> to vector<1x4xf32>
    %134 = arith.maximumf %132, %133 : vector<1x4xf32>
    %c4_82 = arith.constant 4 : index
    %c0_83 = arith.constant 0 : index
    %135 = vector.load %arg12[%c4_82, %c0_83] : memref<7x4xf32, #tpu.memory_space<vmem>>, vector<1x4xf32>
    tpu.vector_store %arg12[%c4_82, %c0_83], %134 {strides = array<i32>} : memref<7x4xf32, #tpu.memory_space<vmem>>, vector<1x4xf32>,
    %136 = vector.extract_strided_slice %115 {offsets = [10, 0], sizes = [1, 4], strides = [1, 1]} : vector<14x4xf32> to vector<1x4xf32>
    %137 = vector.extract_strided_slice %115 {offsets = [11, 0], sizes = [1, 4], strides = [1, 1]} : vector<14x4xf32> to vector<1x4xf32>
    %138 = arith.maximumf %136, %137 : vector<1x4xf32>
    %c5_84 = arith.constant 5 : index
    %c0_85 = arith.constant 0 : index
    %139 = vector.load %arg12[%c5_84, %c0_85] : memref<7x4xf32, #tpu.memory_space<vmem>>, vector<1x4xf32>
    tpu.vector_store %arg12[%c5_84, %c0_85], %138 {strides = array<i32>} : memref<7x4xf32, #tpu.memory_space<vmem>>, vector<1x4xf32>,
    %140 = vector.extract_strided_slice %115 {offsets = [12, 0], sizes = [1, 4], strides = [1, 1]} : vector<14x4xf32> to vector<1x4xf32>
    %141 = vector.extract_strided_slice %115 {offsets = [13, 0], sizes = [1, 4], strides = [1, 1]} : vector<14x4xf32> to vector<1x4xf32>
    %142 = arith.maximumf %140, %141 : vector<1x4xf32>
    %c6_86 = arith.constant 6 : index
    %c0_87 = arith.constant 0 : index
    %143 = vector.load %arg12[%c6_86, %c0_87] : memref<7x4xf32, #tpu.memory_space<vmem>>, vector<1x4xf32>
    tpu.vector_store %arg12[%c6_86, %c0_87], %142 {strides = array<i32>} : memref<7x4xf32, #tpu.memory_space<vmem>>, vector<1x4xf32>,
    %c0_88 = arith.constant 0 : index
    %c0_89 = arith.constant 0 : index
    %144 = vector.load %arg12[%c0_88, %c0_89] : memref<7x4xf32, #tpu.memory_space<vmem>>, vector<7x4xf32>
    %145 = vector.extract_strided_slice %144 {offsets = [0, 0], sizes = [5, 4], strides = [1, 1]} : vector<7x4xf32> to vector<5x4xf32>
    %cst_90 = arith.constant dense<0.000000e+00> : vector<5x8xf32>
    %146 = tpu.matmul %145, %14, %cst_90 {dimension_numbers = #tpu.dot_dimension_numbers<[1], [0], [0], [1], [0, 0, 1, 1], [], []>} : vector<5x4xf32>, vector<4x8xf32>, vector<5x8xf32> -> vector<5x8xf32>
    %147 = vector.extract_strided_slice %144 {offsets = [1, 0], sizes = [5, 4], strides = [1, 1]} : vector<7x4xf32> to vector<5x4xf32>
    %cst_91 = arith.constant dense<0.000000e+00> : vector<5x8xf32>
    %148 = tpu.matmul %147, %16, %cst_91 {dimension_numbers = #tpu.dot_dimension_numbers<[1], [0], [0], [1], [0, 0, 1, 1], [], []>} : vector<5x4xf32>, vector<4x8xf32>, vector<5x8xf32> -> vector<5x8xf32>
    %149 = arith.addf %146, %148 : vector<5x8xf32>
    %150 = vector.extract_strided_slice %144 {offsets = [2, 0], sizes = [5, 4], strides = [1, 1]} : vector<7x4xf32> to vector<5x4xf32>
    %cst_92 = arith.constant dense<0.000000e+00> : vector<5x8xf32>
    %151 = tpu.matmul %150, %18, %cst_92 {dimension_numbers = #tpu.dot_dimension_numbers<[1], [0], [0], [1], [0, 0, 1, 1], [], []>} : vector<5x4xf32>, vector<4x8xf32>, vector<5x8xf32> -> vector<5x8xf32>
    %152 = arith.addf %149, %151 : vector<5x8xf32>
    %153 = vector.broadcast %19 : vector<1x8xf32> to vector<5x8xf32>
    %154 = arith.addf %152, %153 : vector<5x8xf32>
    %cst_93 = arith.constant 0.000000e+00 : f32
    %155 = vector.broadcast %cst_93 : f32 to vector<5x8xf32>
    %156 = arith.maximumf %154, %155 : vector<5x8xf32>
    %157 = vector.extract_strided_slice %156 {offsets = [0, 0], sizes = [1, 8], strides = [1, 1]} : vector<5x8xf32> to vector<1x8xf32>
    %158 = vector.extract_strided_slice %156 {offsets = [1, 0], sizes = [1, 8], strides = [1, 1]} : vector<5x8xf32> to vector<1x8xf32>
    %159 = arith.maximumf %157, %158 : vector<1x8xf32>
    %c0_94 = arith.constant 0 : index
    %c0_95 = arith.constant 0 : index
    %160 = vector.load %arg13[%c0_94, %c0_95] : memref<2x8xf32, #tpu.memory_space<vmem>>, vector<1x8xf32>
    tpu.vector_store %arg13[%c0_94, %c0_95], %159 {strides = array<i32>} : memref<2x8xf32, #tpu.memory_space<vmem>>, vector<1x8xf32>,
    %161 = vector.extract_strided_slice %156 {offsets = [2, 0], sizes = [1, 8], strides = [1, 1]} : vector<5x8xf32> to vector<1x8xf32>
    %162 = vector.extract_strided_slice %156 {offsets = [3, 0], sizes = [1, 8], strides = [1, 1]} : vector<5x8xf32> to vector<1x8xf32>
    %163 = arith.maximumf %161, %162 : vector<1x8xf32>
    %c1_96 = arith.constant 1 : index
    %c0_97 = arith.constant 0 : index
    %164 = vector.load %arg13[%c1_96, %c0_97] : memref<2x8xf32, #tpu.memory_space<vmem>>, vector<1x8xf32>
    tpu.vector_store %arg13[%c1_96, %c0_97], %163 {strides = array<i32>} : memref<2x8xf32, #tpu.memory_space<vmem>>, vector<1x8xf32>,
    %c0_98 = arith.constant 0 : index
    %c0_99 = arith.constant 0 : index
    %165 = vector.load %arg13[%c0_98, %c0_99] : memref<2x8xf32, #tpu.memory_space<vmem>>, vector<2x8xf32>
    %166 = vector.extract_strided_slice %0 {offsets = [1, 0], sizes = [1, 4], strides = [1, 1]} : vector<2x4xf32> to vector<1x4xf32>
    %cst_100 = arith.constant dense<0.000000e+00> : vector<1x32xf32>
    %167 = tpu.matmul %166, %1, %cst_100 {dimension_numbers = #tpu.dot_dimension_numbers<[1], [0], [0], [1], [0, 0, 1, 1], [], []>} : vector<1x4xf32>, vector<4x32xf32>, vector<1x32xf32> -> vector<1x32xf32>
    %168 = arith.addf %167, %3 : vector<1x32xf32>
    %169 = vector.extract_strided_slice %165 {offsets = [0, 0], sizes = [1, 8], strides = [1, 1]} : vector<2x8xf32> to vector<1x8xf32>
    %170 = vector.extract_strided_slice %2 {offsets = [0, 0], sizes = [8, 32], strides = [1, 1]} : vector<16x32xf32> to vector<8x32xf32>
    %cst_101 = arith.constant dense<0.000000e+00> : vector<1x32xf32>
    %171 = tpu.matmul %169, %170, %cst_101 {dimension_numbers = #tpu.dot_dimension_numbers<[1], [0], [0], [1], [0, 0, 1, 1], [], []>} : vector<1x8xf32>, vector<8x32xf32>, vector<1x32xf32> -> vector<1x32xf32>
    %172 = arith.addf %168, %171 : vector<1x32xf32>
    %173 = vector.extract_strided_slice %165 {offsets = [1, 0], sizes = [1, 8], strides = [1, 1]} : vector<2x8xf32> to vector<1x8xf32>
    %174 = vector.extract_strided_slice %2 {offsets = [8, 0], sizes = [8, 32], strides = [1, 1]} : vector<16x32xf32> to vector<8x32xf32>
    %cst_102 = arith.constant dense<0.000000e+00> : vector<1x32xf32>
    %175 = tpu.matmul %173, %174, %cst_102 {dimension_numbers = #tpu.dot_dimension_numbers<[1], [0], [0], [1], [0, 0, 1, 1], [], []>} : vector<1x8xf32>, vector<8x32xf32>, vector<1x32xf32> -> vector<1x32xf32>
    %176 = arith.addf %172, %175 : vector<1x32xf32>
    %cst_103 = arith.constant 0.000000e+00 : f32
    %177 = vector.broadcast %cst_103 : f32 to vector<1x32xf32>
    %178 = arith.maximumf %176, %177 : vector<1x32xf32>
    %cst_104 = arith.constant dense<0.000000e+00> : vector<1x32xf32>
    %179 = tpu.matmul %178, %4, %cst_104 {dimension_numbers = #tpu.dot_dimension_numbers<[1], [0], [0], [1], [0, 0, 1, 1], [], []>} : vector<1x32xf32>, vector<32x32xf32>, vector<1x32xf32> -> vector<1x32xf32>
    %180 = arith.addf %179, %5 : vector<1x32xf32>
    %cst_105 = arith.constant 0.000000e+00 : f32
    %181 = vector.broadcast %cst_105 : f32 to vector<1x32xf32>
    %182 = arith.maximumf %180, %181 : vector<1x32xf32>
    %c1_106 = arith.constant 1 : index
    %c0_107 = arith.constant 0 : index
    %183 = vector.load %arg11[%c1_106, %c0_107] : memref<2x32xf32, #tpu.memory_space<vmem>>, vector<1x32xf32>
    tpu.vector_store %arg11[%c1_106, %c0_107], %182 {strides = array<i32>} : memref<2x32xf32, #tpu.memory_space<vmem>>, vector<1x32xf32>,
    return
  }
}

</mosaic_0001>

<bundles_post_ra>
// kernel: _lambda_.1
= control target key start
LH: loop header
LB: loop body
LE: loop exit
PB: predicated region body
PF: predicated region fallthrough
CT: control target
= control target key end

     0   :  { %16 = vsyncpa [#allocation5], 0  ;;  %s2505_s0 = inlined_call_operand.vmem [shape: f32[2,4], index: 0, kind: input, shape index: {}]   ;;  %s2506_s1 = inlined_call_operand.vmem [shape: f32[2,16,2], index: 1, kind: input, shape index: {}]   ;;  %s2507_s2 = inlined_call_operand.hbm [shape: f32[3,2,4], index: 2, kind: input, shape index: {}]   ;;  %s2508_s3 = inlined_call_operand.hbm [shape: f32[1,4], index: 3, kind: input, shape index: {}]   ;;  %s2509_s4 = inlined_call_operand.vmem [shape: f32[3,4,8], index: 4, kind: input, shape index: {}]   ;;  %s2510_s5 = inlined_call_operand.vmem [shape: f32[1,8], index: 5, kind: input, shape index: {}]   ;;  %s2511_s6 = inlined_call_operand.vmem [shape: f32[4,32], index: 6, kind: input, shape index: {}]   ;;  %s2512_s7 = inlined_call_operand.vmem [shape: f32[16,32], index: 7, kind: input, shape index: {}]   ;;  %s2513_s8 = inlined_call_operand.hbm [shape: f32[1,32], index: 8, kind: input, shape index: {}]   ;;  %s2514_s9 = inlined_call_operand.vmem [shape: f32[32,32], index: 9, kind: input, shape index: {}]   ;;  %s2515_s10 = inlined_call_operand.hbm [shape: f32[1,32], index: 10, kind: input, shape index: {}]   ;;  %s2516_s11 = inlined_call_operand.hbm [shape: f32[2,32], index: 11, kind: output, shape index: {}]  }
   0x1   :  { %17 = vsyncpa [#allocation8], 0 }
   0x2   :  { %18 = vsyncpa [#allocation11], 0 }
   0x3   :  { %19 = vsyncpa [#allocation6], 0  ;;  %s2134_s17 = smov [#allocation7]   ;;  %s2135_s19 = smov [#allocation4]  }
   0x4   :  { %s42_s18 = sshll.u32 %s2134_s17, 4  ;;  %s29_s20 = sshll.u32 %s2135_s19, 4  ;;  %s43_s18 = int_to_ptr.vmem [resolvable:$true] %s42_s18  ;;  %s2204_s20 = int_to_ptr.vmem [resolvable:$true] %s29_s20 }
   0x5   :  { %s2016_s23 = scalar_lea.hbm %s2508_s3, 16 }
   0x6   :  { %p2017_p0 = scmp.ne.s32.totalorder %s2508_s3, %s2016_s23  ;;  %p2020_p1 = scmp.lt.u32.totalorder %s2016_s23, %s2508_s3 }
   0x8   :  { %p2022_p2 = pnand %p2020_p1, %p2017_p0 }
   0xa   :  { %2025 = shalt.err (!%p2022_p2)
}
   0xb   :  { %s2026_s28 = scalar_lea.vmem %s43_s18, 16  ;;  %s2030_s29 = scalar_lea.vmem %s43_s18, 32 }
   0xc   :  { %p2027_p3 = scmp.ne.s32.totalorder %s43_s18, %s2026_s28  ;;  %p2031_p4 = scmp.lt.s32.totalorder %s43_s18, %s43_s18 }
   0xd   :  { %p2032_p5 = scmp.lt.s32.totalorder %s2030_s29, %s2026_s28 }
   0xf   :  { %p2033_p6 = por %p2032_p5, %p2031_p4 }
  0x11   :  { %p2034_p7 = pnand %p2033_p6, %p2027_p3 }
  0x13   :  { %2037 = shalt.err (!%p2034_p7)
}
  0x14   :  { %45 = dma.hbm_to_vmem [thread:$0]  %s2508_s3, 16, %s43_s18, [#allocation8]  }
  0x15   :  { %s2038_s15 = scalar_lea.hbm %s2507_s2, 96 }
  0x16   :  { %p2039_p8 = scmp.ne.s32.totalorder %s2507_s2, %s2038_s15  ;;  %p2042_p9 = scmp.lt.u32.totalorder %s2038_s15, %s2507_s2 }
  0x18   :  { %p2044_p10 = pnand %p2042_p9, %p2039_p8 }
  0x1a   :  { %2047 = shalt.err (!%p2044_p10)
}
  0x1b   :  { %s2048_s22 = scalar_lea.vmem %s2204_s20, 96  ;;  %p2053_p12 = scmp.lt.s32.totalorder %s2204_s20, %s2204_s20 }
  0x1c   :  { %p2049_p11 = scmp.ne.s32.totalorder %s2204_s20, %s2048_s22  ;;  %p2054_p13 = scmp.lt.s32.totalorder %s2048_s22, %s2048_s22 }
  0x1e   :  { %p2055_p0 = por %p2054_p13, %p2053_p12 }
  0x20   :  { %p2056_p1 = pnand %p2055_p0, %p2049_p11 }
  0x22   :  { %2059 = shalt.err (!%p2056_p1)
}
  0x23   :  { %s2136_s3 = smov 32   ;;  %s2137_s18 = smov 2  }
  0x24   :  { %35 = dma.hbm_to_vmem [thread:$0]  %s2507_s2, 96, %s2204_s20, [#allocation5], %s2136_s3, %s2136_s3, %s2137_s18  }
  0x25   :  { %s2138_s25 = smov [#allocation9]   ;;  %s2139_s27 = smov [#allocation10]  }
  0x26   :  { %s60_s26 = sshll.u32 %s2138_s25, 4  ;;  %s72_s28 = sshll.u32 %s2139_s27, 4  ;;  %s61_s26 = int_to_ptr.vmem [resolvable:$true] %s60_s26  ;;  %s73_s28 = int_to_ptr.vmem [resolvable:$true] %s72_s28 }
  0x27   :  { %s2060_s12 = scalar_lea.hbm %s2513_s8, 16 }
  0x28   :  { %p2061_p2 = scmp.ne.s32.totalorder %s2513_s8, %s2060_s12  ;;  %p2064_p3 = scmp.lt.u32.totalorder %s2060_s12, %s2513_s8 }
  0x2a   :  { %p2066_p4 = pnand %p2064_p3, %p2061_p2 }
  0x2c   :  { %2069 = shalt.err (!%p2066_p4)
}
  0x2d   :  { %s2070_s2 = scalar_lea.vmem %s61_s26, 16  ;;  %s2074_s20 = scalar_lea.vmem %s61_s26, 32 }
  0x2e   :  { %p2071_p5 = scmp.ne.s32.totalorder %s61_s26, %s2070_s2  ;;  %p2075_p6 = scmp.lt.s32.totalorder %s61_s26, %s61_s26 }
  0x2f   :  { %p2076_p7 = scmp.lt.s32.totalorder %s2074_s20, %s2070_s2 }
  0x31   :  { %p2077_p8 = por %p2076_p7, %p2075_p6 }
  0x33   :  { %p2078_p9 = pnand %p2077_p8, %p2071_p5 }
  0x35   :  { %2081 = shalt.err (!%p2078_p9)
}
  0x36   :  { %63 = dma.hbm_to_vmem [thread:$0]  %s2513_s8, 16, %s61_s26, [#allocation8]  }
  0x37   :  { %s2082_s3 = scalar_lea.hbm %s2515_s10, 16 }
  0x38   :  { %p2083_p10 = scmp.ne.s32.totalorder %s2515_s10, %s2082_s3  ;;  %p2086_p11 = scmp.lt.u32.totalorder %s2082_s3, %s2515_s10 }
  0x3a   :  { %p2088_p12 = pnand %p2086_p11, %p2083_p10 }
  0x3c   :  { %2091 = shalt.err (!%p2088_p12)
}
  0x3d   :  { %s2092_s27 = scalar_lea.vmem %s73_s28, 16  ;;  %s2096_s29 = scalar_lea.vmem %s73_s28, 32 }
  0x3e   :  { %p2093_p13 = scmp.ne.s32.totalorder %s73_s28, %s2092_s27  ;;  %p2097_p0 = scmp.lt.s32.totalorder %s73_s28, %s73_s28 }
  0x3f   :  { %p2098_p1 = scmp.lt.s32.totalorder %s2096_s29, %s2092_s27 }
  0x41   :  { %p2099_p2 = por %p2098_p1, %p2097_p0 }
  0x43   :  { %p2100_p3 = pnand %p2099_p2, %p2093_p13 }
  0x45   :  { %2103 = shalt.err (!%p2100_p3)
}
  0x46   :  { %75 = dma.hbm_to_vmem [thread:$0]  %s2515_s10, 16, %s73_s28, [#allocation11]  }
  0x47   :  { %2126 = dma.done.wait [#allocation5], 96  }
  0x48   :  { %2127 = vsyncadd [#allocation5], 4294967200 }
  0x49   :  { %2128 = dma.done.wait [#allocation8], 32  }
  0x4a   :  { %2129 = vsyncadd [#allocation8], 4294967264 }
  0x4b   :  { %2130 = dma.done.wait [#allocation11], 16  }
  0x4c   :  { %2131 = vsyncadd [#allocation11], 4294967280  ;;  %vm123_vm0 = vcmask 1041408   ;;  %v2259_v0 = vld [vmem:[#allocation4 + $0x2] sm:$0x3]  ;;  %v110_v1 = vld [vmem:[%s2506_s1] sm:$0xff] }
  0x4d   :  { %v111_v2 = vld [vmem:[%s2506_s1 + $0x8] sm:$0xff]  ;;  %vm114_vm1 = vcmask 1046528   ;;  %1864 = vmatprep.subr.msk.mxu0 %vm123_vm0, %v2259_v0  ;;  %v115_v3 = vrot.slane %v110_v1, 1  ;;  %vm118_vm2 = vcmask 15360   ;;  %v285_v8 = vrot.slane %v110_v1, 2  ;;  %v2358_v31 = vld [vmem:[%s2512_s7] sm:$0xff] }
  0x4e   :  { %v116_v4 = vrot.slane %v111_v2, 1  ;;  %v2269_v5 = vld [vmem:[#allocation4] sm:$0x3]  ;;  %1865 = vmatpush3.msk.msra.mxu0 %vm123_vm0, %v2259_v0  ;;  %v2277_v7 = vld [vmem:[#allocation4 + $0x4] sm:$0x3]  ;;  %v286_v9 = vrot.slane %v111_v2, 2 }
  0x4f   :  { %1869 = vmatprep.subr.msk.mxu0 %vm123_vm0, %v2269_v5  ;;  %vm284_vm3 = vcmask 1045504   ;;  %v2294_v11 = vld [vmem:[%s2509_s4 + $0x4] sm:$0xf]  ;;  %vm407_vm4 = vcmask 1043456   ;;  %v2140_v12 = vmov 0.0   ;;  %vm2141_vm5 = vmmov 0  }
  0x50   :  { %v117_v6 = vsel %vm114_vm1, %v115_v3, %v116_v4  ;;  %v287_v10 = vsel %vm284_vm3, %v285_v8, %v286_v9  ;;  %1879 = vmatprep.subr.mxu1 %v2140_v12  ;;  %1881 = vmatprep.mubr.msk.f32.mxu1 %vm2141_vm5, %v2140_v12  ;;  %v2305_v13 = vld [vmem:[#allocation7] ss:$0 sm:$0xff]  ;;  %vm386_vm6 = vcmask 24576   ;;  %vm388_vm7 = vcmask 26626   ;;  %v2319_v26 = vld [vmem:[%s2509_s4] sm:$0xf] }
  0x51   :  { %1866 = vmatprep.mubr.msk.f32.mxu0 %vm118_vm2, %v117_v6  ;;  %1880 = vmatpush3.msk.msra.mxu1 %vm407_vm4, %v2294_v11  ;;  %vm390_vm8 = vcmask 28676   ;;  %vm392_vm9 = vcmask 30726   ;;  %vm404_vm10 = vcmask 31744   ;;  %v2330_v27 = vld [vmem:[%s2509_s4 + $0x8] sm:$0xf]  ;;  %v93_v32 = vld [vmem:[%s2514_s9] sm:$0xff] }
  0x52   :  { %1867 = vmatmul.mubr.msk.f32.vlgmr.msra.gmra.mrb[0].mxu0 %vm118_vm2, %v116_v4  ;;  %1884 = vmatprep.subr.mxu1 %v2140_v12  ;;  %v2343_v29 = vld [vmem:[%s2511_s6] sm:$0xf]  ;;  %v94_v33 = vld [vmem:[%s2514_s9 + $0x8] sm:$0xff]  ;;  %v2142_v34 = vmov 0.0|0.0   ;;  %vm645_vm11 = vcmask 57344   ;;  %vm647_vm12 = vcmask 59394  }
  0x53   :  { %1870 = vmatpush3.msk.msra.mxu0 %vm123_vm0, %v2269_v5  ;;  %1871 = vmatprep.mubr.msk.f32.mxu0 %vm118_vm2, %v110_v1  ;;  %v2350_v30 = vld [vmem:[%s2505_s0] sm:$0x3]  ;;  %v2371_v35 = vpack.c.bf16 %v94_v33, %v93_v32  ;;  %vm726_vm13 = vcmask 64512   ;;  %v2386_v49 = vld [vmem:[%s2512_s7 + $0x8] sm:$0xff]  ;;  %v95_v52 = vld [vmem:[%s2514_s9 + $0x10] sm:$0xff]  ;;  %vm876_vm14 = vcmask 261120  }
  0x54   :  { %1874 = vmatprep.subr.msk.mxu0 %vm123_vm0, %v2277_v7  ;;  %v2378_v41 = vld [vmem:[%s2510_s5] ss:$0 sm:$0xff]  ;;  %v96_v53 = vld [vmem:[%s2514_s9 + $0x18] sm:$0xff]  ;;  %v1790_v55 = vld [vmem:[%s2506_s1 + $0x10] sm:$0xff]  ;;  %vm951_vm15 = vcmask 253952  }
  0x55   :  { %v2405_v54 = vpack.c.bf16 %v96_v53, %v95_v52  ;;  %v1791_v56 = vld [vmem:[%s2506_s1 + $0x18] sm:$0xff]  ;;  %v2416_v57 = vld [vmem:[#allocation9] sm:$0x1]  ;;  %v958_v58 = vrot.slane %v1790_v55, 1  ;;  %s2143_s1 = smov [#allocation12]  }
  0x56   :  { %v959_v59 = vrot.slane %v1791_v56, 1  ;;  %v1120_v3 = vrot.slane %v1791_v56, 2  ;;  %s1755_s9 = sshll.u32 %s2143_s1, 4  ;;  %s1756_s9 = int_to_ptr.vmem [resolvable:$true] %s1755_s9 }
  0x57   :  { %s2104_s10 = scalar_lea.vmem %s1756_s9, 32  ;;  %p2109_p5 = scmp.lt.s32.totalorder %s1756_s9, %s1756_s9 }
  0x58   :  { %v960_v1 = vsel %vm114_vm1, %v958_v58, %v959_v59  ;;  %p2105_p4 = scmp.ne.s32.totalorder %s1756_s9, %s2104_s10  ;;  %p2110_p6 = scmp.lt.s32.totalorder %s2104_s10, %s2104_s10 }
  0x5a   :  { %1872 = vmatmul.mubr.msk.f32.vlgmr.msra.gmra.mrb[0].mxu0 %vm118_vm2, %v111_v2  ;;  %v1119_v2 = vrot.slane %v1790_v55, 2  ;;  %p2111_p7 = por %p2110_p6, %p2109_p5 }
  0x5b   :  { %1875 = vmatpush3.msk.msra.mxu0 %vm123_vm0, %v2277_v7  ;;  %1876 = vmatprep.mubr.msk.f32.mxu0 %vm118_vm2, %v287_v10 }
  0x5c   :  { %1894 = vmatprep.subr.mxu0 %v2140_v12  ;;  %v1121_v4 = vsel %vm284_vm3, %v1119_v2, %v1120_v3  ;;  %p2112_p8 = pnand %p2111_p7, %p2105_p4 }
  0x62   :  { %1877 = vmatmul.mubr.msk.f32.vlgmr.msra.gmra.mrb[0].mxu0 %vm118_vm2, %v286_v9 }
  0x63   :  { %1896 = vmatprep.mubr.msk.f32.mxu0 %vm2141_vm5, %v2140_v12  ;;  %1895 = vmatpush3.msk.msra.mxu0 %vm407_vm4, %v2343_v29 }
  0x64   :  { %1899 = vmatprep.subr.mxu0 %v2140_v12 }
  0x66   :  { %1897 = vmatmul.mubr.msk.f32.vlgmr.msra.gmra.mrb[2].mxu0 %vm404_vm10, %v2350_v30 }
  0x67   :  { %1900 = vmatpush3.msra.mxu0 %v2358_v31  ;;  %1901 = vmatprep.mubr.msk.f32.mxu0 %vm2141_vm5, %v2140_v12 }
  0x68   :  { %1904 = vmatprep.subr.mxu0 %v2140_v12 }
 0x135   :  { %v1878_v14 = vpop.f32.mrb[0].mxu0 }
 0x136   :  { %v379_v15 = vadd.f32 %v1878_v14, %v2305_v13  ;;  %v361_v16 = vpop.f32.mrb[1].mxu0 }
 0x137   :  { %v378_v17 = vadd.f32 %v2305_v13, %v361_v16 }
 0x138   :  { %v381_v18 = vmax.f32 %v379_v15, 0.0 }
 0x139   :  { %v380_v19 = vmax.f32 %v378_v17, 0.0 }
 0x13a   :  { %v395_v20 = vrot.slane %v381_v18, 1 }
 0x13b   :  { %v383_v21 = vrot.slane %v380_v19, 1 }
 0x13c   :  { %v397_v22 = vmax.f32 %v381_v18, %v395_v20 }
 0x13d   :  { %v385_v23 = vmax.f32 %v380_v19, %v383_v21 }
 0x13e   :  { %398 = vst.msk [vmem:[#allocation2 + $0x4] sm:$0x1] %vm386_vm6, %v397_v22 }
 0x13f   :  { %399 = vst.msk [vmem:[#allocation2 + $0x3] sm:$0x4] %vm388_vm7, %v397_v22  ;;  %389 = vst.msk [vmem:[#allocation2 - $0x1] sm:$0x4] %vm388_vm7, %v385_v23 }
 0x140   :  { %400 = vst.msk [vmem:[#allocation2 + $0x2] sm:$0x10] %vm390_vm8, %v397_v22  ;;  %391 = vst.msk [vmem:[#allocation2 - $0x2] sm:$0x10] %vm390_vm8, %v385_v23 }
 0x141   :  { %387 = vst.msk [vmem:[#allocation2] sm:$0x1] %vm386_vm6, %v385_v23 }
 0x142   :  { %393 = vst.msk [vmem:[#allocation2 - $0x3] sm:$0x40] %vm392_vm9, %v385_v23 }
 0x149   :  { %v401_v24 = vld [vmem:[#allocation2] sm:$0x7f] }
 0x14a   :  { %v403_v25 = vrot.slane %v401_v24, 1  ;;  %v556_v28 = vrot.slane %v401_v24, 2 }
 0x14c   :  { %1882 = vmatmul.mubr.msk.f32.vlgmr.msra.gmra.mrb[0].mxu1 %vm404_vm10, %v403_v25 }
 0x14d   :  { %1885 = vmatpush3.msk.msra.mxu1 %vm407_vm4, %v2319_v26  ;;  %1886 = vmatprep.mubr.msk.f32.mxu1 %vm2141_vm5, %v2140_v12 }
 0x14e   :  { %1889 = vmatprep.subr.mxu1 %v2140_v12 }
 0x150   :  { %1887 = vmatmul.mubr.msk.f32.vlgmr.msra.gmra.mrb[2].mxu1 %vm404_vm10, %v401_v24 }
 0x151   :  { %1890 = vmatpush3.msk.msra.mxu1 %vm407_vm4, %v2330_v27  ;;  %1891 = vmatprep.mubr.msk.f32.mxu1 %vm2141_vm5, %v2140_v12 }
 0x152   :  { %1976 = vmatprep.subr.bf16.mxu1 %v2142_v34 }
 0x154   :  { %1892 = vmatmul.mubr.msk.f32.vlgmr.msra.gmra.mrb[4].mxu1 %vm404_vm10, %v556_v28 }
 0x155   :  { %1917 = vmatprep.mubr.msk.f32.mxu1 %vm2141_vm5, %v2140_v12  ;;  %1978 = vmatpush3.bf16.msra.mxu1 %v2371_v35 }
 0x156   :  { %1979 = vmatprep.subr.bf16.mxu1 %v2142_v34 }
 0x159   :  { %1981 = vmatpush3.bf16.msra.mxu1 %v2405_v54 }
 0x15a   :  { %1920 = vmatprep.subr.msk.mxu1 %vm123_vm0, %v2259_v0 }
 0x21f   :  { %v477_v36 = vpop.f32.mrb[0].mxu1 }
 0x220   :  { %v1883_v37 = vpop.f32.mrb[1].mxu1 }
 0x223   :  { %v552_v38 = vpop.f32.mrb[2].mxu1 }
 0x224   :  { %v553_v39 = vadd.f32 %v552_v38, %v477_v36  ;;  %v1888_v40 = vpop.f32.mrb[3].mxu1 }
 0x227   :  { %v628_v42 = vpop.f32.mrb[4].mxu1 }
 0x228   :  { %v632_v43 = vadd.f32 %v628_v42, %v553_v39  ;;  %v1893_v44 = vpop.f32.mrb[5].mxu1 }
 0x22a   :  { %v639_v45 = vadd.f32 %v2378_v41, %v632_v43 }
 0x22c   :  { %v640_v46 = vmax.f32 %v639_v45, 0.0 }
 0x22e   :  { %v642_v47 = vrot.slane %v640_v46, 1 }
 0x230   :  { %v644_v48 = vmax.f32 %v640_v46, %v642_v47 }
 0x232   :  { %646 = vst.msk [vmem:[#allocation3] sm:$0x1] %vm645_vm11, %v644_v48 }
 0x233   :  { %648 = vst.msk [vmem:[#allocation3 - $0x1] sm:$0x4] %vm647_vm12, %v644_v48 }
 0x23a   :  { %v649_v50 = vld [vmem:[#allocation3] sm:$0x3] }
 0x23b   :  { %1902 = vmatmul.mubr.msk.f32.vlgmr.msra.gmra.mrb[2].mxu0 %vm726_vm13, %v649_v50  ;;  %v801_v51 = vrot.slane %v649_v50, 1 }
 0x23c   :  { %1905 = vmatpush3.msra.mxu0 %v2386_v49  ;;  %1906 = vmatprep.mubr.msk.f32.mxu0 %vm2141_vm5, %v2140_v12 }
 0x23d   :  { %1935 = vmatprep.subr.mxu0 %v2140_v12 }
 0x243   :  { %1907 = vmatmul.mubr.msk.f32.vlgmr.msra.gmra.mrb[2].mxu0 %vm726_vm13, %v801_v51 }
 0x244   :  { %1936 = vmatpush3.msk.msra.mxu0 %vm407_vm4, %v2294_v11  ;;  %1937 = vmatprep.mubr.msk.f32.mxu0 %vm2141_vm5, %v2140_v12 }
 0x245   :  { %1940 = vmatprep.subr.mxu0 %v2140_v12 }
 0x316   :  { %v870_v60 = vpop.f32.mrb[2].mxu0 }
 0x317   :  { %v1988_v61 = vadd.f32 %v870_v60, %v2416_v57  ;;  %v1908_v62 = vpop.f32.mrb[3].mxu0 }
 0x319   :  { %v875_v63 = vmax.f32 %v1988_v61, 0.0 }
 0x31b   :  { %1918 = vmatmul.mubr.msk.f32.vlgmr.msra.gmra.mrb[6].mxu1 %vm876_vm14, %v875_v63 }
 0x31c   :  { %1921 = vmatpush3.msk.msra.mxu1 %vm123_vm0, %v2259_v0  ;;  %1922 = vmatprep.mubr.msk.f32.mxu1 %vm118_vm2, %v960_v1  ;;  %v1452_v0 = vrot.slane %v2350_v30, 1 }
 0x31d   :  { %1925 = vmatprep.subr.msk.mxu1 %vm123_vm0, %v2269_v5 }
 0x31f   :  { %1923 = vmatmul.mubr.msk.f32.vlgmr.msra.gmra.mrb[8].mxu1 %vm118_vm2, %v959_v59 }
 0x320   :  { %1926 = vmatpush3.msk.msra.mxu1 %vm123_vm0, %v2269_v5  ;;  %1927 = vmatprep.mubr.msk.f32.mxu1 %vm118_vm2, %v1790_v55  ;;  %v2450_v5 = vld [vmem:[#allocation10] sm:$0x1] }
 0x321   :  { %1930 = vmatprep.subr.msk.mxu1 %vm123_vm0, %v2277_v7 }
 0x327   :  { %1928 = vmatmul.mubr.msk.f32.vlgmr.msra.gmra.mrb[8].mxu1 %vm118_vm2, %v1791_v56 }
 0x328   :  { %1931 = vmatpush3.msk.msra.mxu1 %vm123_vm0, %v2277_v7  ;;  %1932 = vmatprep.mubr.msk.f32.mxu1 %vm118_vm2, %v1121_v4 }
 0x329   :  { %1950 = vmatprep.subr.mxu1 %v2140_v12 }
 0x32f   :  { %1933 = vmatmul.mubr.msk.f32.vlgmr.msra.gmra.mrb[8].mxu1 %vm118_vm2, %v1120_v3 }
 0x330   :  { %1951 = vmatpush3.msk.msra.mxu1 %vm407_vm4, %v2343_v29  ;;  %1952 = vmatprep.mubr.msk.f32.mxu1 %vm2141_vm5, %v2140_v12 }
 0x331   :  { %1955 = vmatprep.subr.mxu1 %v2140_v12 }
 0x333   :  { %1953 = vmatmul.mubr.msk.f32.vlgmr.msra.gmra.mrb[10].mxu1 %vm404_vm10, %v1452_v0 }
 0x334   :  { %1956 = vmatpush3.msra.mxu1 %v2358_v31  ;;  %1957 = vmatprep.mubr.msk.f32.mxu1 %vm2141_vm5, %v2140_v12 }
 0x335   :  { %1960 = vmatprep.subr.mxu1 %v2140_v12 }
 0x3ee   :  { %v946_v6 = vpop.f32.mrb[6].mxu1 }
 0x3ef   :  { %v947_v7 = vadd.f32 %v946_v6, %v2450_v5  ;;  %v1919_v8 = vpop.f32.mrb[7].mxu1 }
 0x3f1   :  { %v950_v9 = vmax.f32 %v947_v7, 0.0 }
 0x3f3   :  { %952 = vst.msk [vmem:[#allocation12] sm:$0x1] %vm951_vm15, %v950_v9 }
 0x402   :  { %v1934_v10 = vpop.f32.mrb[8].mxu1 }
 0x403   :  { %v1204_v11 = vadd.f32 %v1934_v10, %v2305_v13  ;;  %v1192_v14 = vpop.f32.mrb[9].mxu1 }
 0x404   :  { %v1203_v15 = vadd.f32 %v2305_v13, %v1192_v14 }
 0x405   :  { %v1206_v16 = vmax.f32 %v1204_v11, 0.0 }
 0x406   :  { %v1205_v17 = vmax.f32 %v1203_v15, 0.0 }
 0x407   :  { %v1216_v18 = vrot.slane %v1206_v16, 1 }
 0x408   :  { %v1208_v19 = vrot.slane %v1205_v17, 1 }
 0x409   :  { %v1218_v20 = vmax.f32 %v1206_v16, %v1216_v18 }
 0x40a   :  { %v1210_v21 = vmax.f32 %v1205_v17, %v1208_v19 }
 0x40b   :  { %1219 = vst.msk [vmem:[#allocation2 + $0x4] sm:$0x1] %vm386_vm6, %v1218_v20 }
 0x40c   :  { %1220 = vst.msk [vmem:[#allocation2 + $0x3] sm:$0x4] %vm388_vm7, %v1218_v20  ;;  %1212 = vst.msk [vmem:[#allocation2 - $0x1] sm:$0x4] %vm388_vm7, %v1210_v21 }
 0x40d   :  { %1221 = vst.msk [vmem:[#allocation2 + $0x2] sm:$0x10] %vm390_vm8, %v1218_v20  ;;  %1213 = vst.msk [vmem:[#allocation2 - $0x2] sm:$0x10] %vm390_vm8, %v1210_v21 }
 0x40e   :  { %1211 = vst.msk [vmem:[#allocation2] sm:$0x1] %vm386_vm6, %v1210_v21 }
 0x40f   :  { %1214 = vst.msk [vmem:[#allocation2 - $0x3] sm:$0x40] %vm392_vm9, %v1210_v21 }
 0x416   :  { %v1222_v13 = vld [vmem:[#allocation2] sm:$0x7f] }
 0x417   :  { %v1224_v22 = vrot.slane %v1222_v13, 1  ;;  %v1369_v23 = vrot.slane %v1222_v13, 2 }
 0x419   :  { %1938 = vmatmul.mubr.msk.f32.vlgmr.msra.gmra.mrb[4].mxu0 %vm404_vm10, %v1224_v22 }
 0x41a   :  { %1941 = vmatpush3.msk.msra.mxu0 %vm407_vm4, %v2319_v26  ;;  %1942 = vmatprep.mubr.msk.f32.mxu0 %vm2141_vm5, %v2140_v12 }
 0x41b   :  { %1945 = vmatprep.subr.mxu0 %v2140_v12 }
 0x41d   :  { %1943 = vmatmul.mubr.msk.f32.vlgmr.msra.gmra.mrb[6].mxu0 %vm404_vm10, %v1222_v13 }
 0x41e   :  { %1946 = vmatpush3.msk.msra.mxu0 %vm407_vm4, %v2330_v27  ;;  %1947 = vmatprep.mubr.msk.f32.mxu0 %vm2141_vm5, %v2140_v12 }
 0x41f   :  { %1982 = vmatprep.subr.bf16.mxu0 %v2142_v34 }
 0x421   :  { %1948 = vmatmul.mubr.msk.f32.vlgmr.msra.gmra.mrb[8].mxu0 %vm404_vm10, %v1369_v23 }
 0x422   :  { %1984 = vmatpush3.bf16.msra.mxu0 %v2371_v35  ;;  %1973 = vmatprep.mubr.msk.f32.mxu0 %vm2141_vm5, %v2140_v12 }
 0x423   :  { %1985 = vmatprep.subr.bf16.mxu0 %v2142_v34 }
 0x426   :  { %1987 = vmatpush3.bf16.msra.mxu0 %v2405_v54 }
 0x4ec   :  { %v1293_v24 = vpop.f32.mrb[4].mxu0 }
 0x4ed   :  { %v1939_v25 = vpop.f32.mrb[5].mxu0 }
 0x4f0   :  { %v1365_v26 = vpop.f32.mrb[6].mxu0 }
 0x4f1   :  { %v1366_v27 = vadd.f32 %v1365_v26, %v1293_v24  ;;  %v1944_v28 = vpop.f32.mrb[7].mxu0 }
 0x4f4   :  { %v1438_v29 = vpop.f32.mrb[8].mxu0 }
 0x4f5   :  { %v1442_v30 = vadd.f32 %v1438_v29, %v1366_v27  ;;  %v1949_v31 = vpop.f32.mrb[9].mxu0 }
 0x4f7   :  { %v1443_v32 = vadd.f32 %v2378_v41, %v1442_v30 }
 0x4f9   :  { %v1444_v33 = vmax.f32 %v1443_v32, 0.0 }
 0x4fb   :  { %v1446_v36 = vrot.slane %v1444_v33, 1 }
 0x4fd   :  { %v1448_v35 = vmax.f32 %v1444_v33, %v1446_v36 }
 0x4ff   :  { %1449 = vst.msk [vmem:[#allocation3] sm:$0x1] %vm645_vm11, %v1448_v35 }
 0x500   :  { %1450 = vst.msk [vmem:[#allocation3 - $0x1] sm:$0x4] %vm647_vm12, %v1448_v35 }
 0x507   :  { %v1451_v34 = vld [vmem:[#allocation3] sm:$0x3] }
 0x508   :  { %1958 = vmatmul.mubr.msk.f32.vlgmr.msra.gmra.mrb[10].mxu1 %vm726_vm13, %v1451_v34  ;;  %v1599_v37 = vrot.slane %v1451_v34, 1 }
 0x509   :  { %1961 = vmatpush3.msra.mxu1 %v2386_v49  ;;  %1962 = vmatprep.mubr.msk.f32.mxu1 %vm2141_vm5, %v2140_v12 }
 0x510   :  { %1963 = vmatmul.mubr.msk.f32.vlgmr.msra.gmra.mrb[10].mxu1 %vm726_vm13, %v1599_v37 }
 0x5e3   :  { %v1668_v38 = vpop.f32.mrb[10].mxu1 }
 0x5e4   :  { %v1989_v39 = vadd.f32 %v1668_v38, %v2416_v57  ;;  %v1964_v40 = vpop.f32.mrb[11].mxu1 }
 0x5e6   :  { %v1673_v41 = vmax.f32 %v1989_v39, 0.0 }
 0x5e8   :  { %1974 = vmatmul.mubr.msk.f32.vlgmr.msra.gmra.mrb[10].mxu0 %vm876_vm14, %v1673_v41 }
 0x6bb   :  { %v1743_v42 = vpop.f32.mrb[10].mxu0 }
 0x6bc   :  { %v1744_v43 = vadd.f32 %v1743_v42, %v2450_v5  ;;  %v1975_v44 = vpop.f32.mrb[11].mxu0 }
 0x6be   :  { %v1747_v45 = vmax.f32 %v1744_v43, 0.0 }
 0x6c0   :  { %1748 = vst.msk [vmem:[#allocation12 + $0x1] sm:$0x1] %vm951_vm15, %v1747_v45 }
 0x6c1   :  { %2115 = shalt.err (!%p2112_p8)
}
 0x6c2   :  { %s2116_s16 = scalar_lea.hbm %s2516_s11, 32 }
 0x6c3   :  { %p2117_p9 = scmp.ne.s32.totalorder %s2516_s11, %s2116_s16  ;;  %p2120_p10 = scmp.lt.u32.totalorder %s2116_s16, %s2516_s11 }
 0x6c5   :  { %p2122_p11 = pnand %p2120_p10, %p2117_p9 }
 0x6c7   :  { %2125 = shalt.err (!%p2122_p11)
}
 0x6c8   :  { %1758 = dma.vmem_to_hbm [thread:$0]  %s1756_s9, 32, %s2516_s11, [#allocation6]  }
 0x6c9   :  { %2132 = dma.done.wait [#allocation6], 32  }
 0x6ca   :  { %2133 = vsyncadd [#allocation6], 4294967264 }
 0x6cb   :  { %1762 = vsyncpa [#allocation5], 1 }
 0x6cc   :  { %1763 = vsyncpa [#allocation8], 1 }
 0x6cd   :  { %1764 = vsyncpa [#allocation11], 1 }
 0x6ce   :  { %1765 = vsyncpa [#allocation6], 1 }

</bundles_post_ra>
